<compile_context>
chip_gen: v7x
topology: tpu7x:2x2x1
jax: 0.10.0
libtpu: 0.0.40
codegen_flags: <defaults>
</compile_context>

<pallas_src>
import functools

import jax
import jax.numpy as jnp
from jax.experimental import pallas as pl
from jax.experimental.pallas import tpu as pltpu

EPS = 1e-5


def _stats_kernel(x_ref, mean_ref, istd_ref, acc_ref, *, inv_l):
    """grid = (2, n_tiles): phase 0 -> per-channel mean, phase 1 -> centered variance."""
    p = pl.program_id(0)            # phase
    t = pl.program_id(1)            # lane tile
    t_last = pl.num_programs(1) - 1

    @pl.when(t == 0)
    def _():
        acc_ref[...] = jnp.zeros_like(acc_ref)

    x = x_ref[...].astype(jnp.float32)          # [Cout, TILE]

    @pl.when(p == 0)
    def _():
        acc_ref[...] += jnp.sum(x, axis=-1, keepdims=True)

    @pl.when((p == 0) & (t == t_last))
    def _():
        mean_ref[...] = acc_ref[...] * inv_l

    @pl.when(p == 1)
    def _():
        d = x - mean_ref[...]                   # centered form (no E[x^2]-E[x]^2)
        acc_ref[...] += jnp.sum(d * d, axis=-1, keepdims=True)

    @pl.when((p == 1) & (t == t_last))
    def _():
        istd_ref[...] = jax.lax.rsqrt(acc_ref[...] * inv_l + EPS)


def _apply_kernel(x_ref, c_ref, w_ref, b_ref, mean_ref, istd_ref, o_ref, *,
                  c_out, c_in, use_mxu):
    """Per lane-tile: fused 1x1 convs + normalize + AdaBN combine."""
    x = x_ref[...].astype(jnp.float32)          # [Cout,   TILE]
    c = c_ref[...].astype(jnp.float32)          # [Cin,    TILE]
    w = w_ref[...].astype(jnp.float32)          # [2*Cout, Cin ]  (gamma ; beta)
    bias = b_ref[...].astype(jnp.float32)       # [2*Cout, 1   ]

    if use_mxu:
        # One fused MXU push for both convs.
        gb = jnp.dot(w, c, preferred_element_type=jnp.float32) + bias
    else:
        # Tiny channel counts: unrolled VPU broadcast-MAC (MXU would be ~97% padding).
        acc = w[:, 0:1] * c[0:1, :]
        for ci in range(1, c_in):
            acc = acc + w[:, ci:ci + 1] * c[ci:ci + 1, :]
        gb = acc + bias

    g = gb[:c_out, :]                           # gamma(cond)
    b = gb[c_out:, :]                           # beta(cond)

    scale = istd_ref[...] * g                   # fold inv-std into gamma (no h temp)
    o_ref[...] = ((x - mean_ref[...]) * scale + b).astype(o_ref.dtype)


def _pick_tile(l, c_out, c_in):
    """Largest lane tile that divides L and keeps double-buffered tiles well under VMEM."""
    budget = 24 * 1024 * 1024
    for t in (4096, 2048, 1024, 512, 256, 128):
        if l % t == 0 and 2 * (2 * c_out + c_in) * t * 4 <= budget:
            return t
    return l            # fall back to whole-axis block (legal: equals full array dim)


def ada_batch_norm(x, cond, wg, bg, wb, bb):
    """x: [B, Cout, N], cond: [B, Cin, N], wg/wb: [Cout, Cin], bg/bb: [Cout, 1]."""
    B, c_out, N = x.shape
    _, c_in, _ = cond.shape
    L = B * N

    # Lane-dense layout: channels on sublanes, flattened (batch, position) on lanes.
    x2 = jnp.transpose(x, (1, 0, 2)).reshape(c_out, L)
    c2 = jnp.transpose(cond, (1, 0, 2)).reshape(c_in, L)
    w2 = jnp.concatenate([wg, wb], axis=0)      # [2*Cout, Cin]
    b2 = jnp.concatenate([bg, bb], axis=0)      # [2*Cout, 1]

    tile = _pick_tile(L, c_out, c_in)
    n_tiles = L // tile

    # ---- Pass 1 & 2: per-channel mean, then centered biased variance -> inv std ----
    mean, istd = pl.pallas_call(
        functools.partial(_stats_kernel, inv_l=1.0 / L),
        out_shape=(jax.ShapeDtypeStruct((c_out, 1), jnp.float32),
                   jax.ShapeDtypeStruct((c_out, 1), jnp.float32)),
        grid=(2, n_tiles),
        in_specs=[pl.BlockSpec((c_out, tile), lambda p, t: (0, t))],
        out_specs=(pl.BlockSpec((c_out, 1), lambda p, t: (0, 0)),
                   pl.BlockSpec((c_out, 1), lambda p, t: (0, 0))),
        scratch_shapes=[pltpu.VMEM((c_out, 1), jnp.float32)],
        compiler_params=pltpu.CompilerParams(
            dimension_semantics=("arbitrary", "arbitrary"),
            vmem_limit_bytes=32 * 1024 * 1024),
    )(x2)

    # ---- Pass 3: normalize + fused 1x1 convs + combine, parallel over lane tiles ----
    use_mxu = (c_in >= 128 and c_out >= 128)
    resident = lambda shape: pl.BlockSpec(shape, lambda t: (0, 0))

    out2 = pl.pallas_call(
        functools.partial(_apply_kernel, c_out=c_out, c_in=c_in, use_mxu=use_mxu),
        out_shape=jax.ShapeDtypeStruct((c_out, L), x.dtype),
        grid=(n_tiles,),
        in_specs=[
            pl.BlockSpec((c_out, tile), lambda t: (0, t)),   # x
            pl.BlockSpec((c_in, tile), lambda t: (0, t)),    # cond
            resident((2 * c_out, c_in)),                     # fused conv weights
            resident((2 * c_out, 1)),                        # fused conv biases
            resident((c_out, 1)),                            # mean
            resident((c_out, 1)),                            # inv std
        ],
        out_specs=pl.BlockSpec((c_out, tile), lambda t: (0, t)),
        compiler_params=pltpu.CompilerParams(
            dimension_semantics=("parallel",),
            vmem_limit_bytes=32 * 1024 * 1024),
    )(x2, c2, w2, b2, mean, istd)

    # Back to PyTorch layout [B, Cout, N].
    return out2.reshape(c_out, B, N).transpose(1, 0, 2)


def ada_batch_norm_ref(x, cond, wg, bg, wb, bb):
    mean = x.mean(axis=(0, 2), keepdims=True)
    var = ((x - mean) ** 2).mean(axis=(0, 2), keepdims=True)
    h = (x - mean) / jnp.sqrt(var + EPS)
    g = jnp.einsum('oc,bcn->bon', wg, cond) + bg[None, :, :]
    b = jnp.einsum('oc,bcn->bon', wb, cond) + bb[None, :, :]
    return h * g + b


if __name__ == "__main__":
    B, Cin, Cout, N = 2, 4, 4, 16

    key = jax.random.PRNGKey(0)
    kx, kc, kwg, kbg, kwb, kbb = jax.random.split(key, 6)

    x = jax.random.normal(kx, (B, Cout, N), dtype=jnp.float32)
    cond = jax.random.normal(kc, (B, Cin, N), dtype=jnp.float32)

    # Conv1d(kernel_size=1) params: weight [Cout, Cin, 1] -> [Cout, Cin], bias [Cout] -> [Cout, 1]
    wg = 0.1 * jax.random.normal(kwg, (Cout, Cin), dtype=jnp.float32)
    bg = 0.1 * jax.random.normal(kbg, (Cout, 1), dtype=jnp.float32)
    wb = 0.1 * jax.random.normal(kwb, (Cout, Cin), dtype=jnp.float32)
    bb = 0.1 * jax.random.normal(kbb, (Cout, 1), dtype=jnp.float32)

    out = ada_batch_norm(x, cond, wg, bg, wb, bb)
    jax.block_until_ready(out)

    ref = ada_batch_norm_ref(x, cond, wg, bg, wb, bb)
    assert out.shape == (B, Cout, N)
    assert jnp.allclose(out, ref, atol=1e-5, rtol=1e-5), "mismatch vs reference"

    print("KERNEL_OK")
</pallas_src>

<mosaic_0001>
module attributes {stable_mosaic.version = 11 : i64} {
  func.func @_stats_kernel(%arg0: i32, %arg1: i32, %arg2: memref<4x32xf32, #tpu.memory_space<vmem>>, %arg3: memref<4x1xf32, #tpu.memory_space<vmem>>, %arg4: memref<4x1xf32, #tpu.memory_space<vmem>>, %arg5: memref<4x1xf32, #tpu.memory_space<vmem>>) attributes {dimension_semantics = [#tpu.dimension_semantics<arbitrary>, #tpu.dimension_semantics<arbitrary>], iteration_bounds = array<i64: 2, 1>, scalar_prefetch = 0 : i64, scratch_operands = 1 : i64, tpu.core_type = #tpu.core_type<tc>, window_params = [{transform_indices = @transform_0, window_bounds = array<i64: 4, 32>}, {pipeline_mode = #tpu.pipeline_mode<synchronous>, transform_indices = @transform_1, window_bounds = array<i64: 4, 1>}, {pipeline_mode = #tpu.pipeline_mode<synchronous>, transform_indices = @transform_2, window_bounds = array<i64: 4, 1>}]} {
    %c0_i32 = arith.constant 0 : i32
    %0 = arith.cmpi eq, %arg1, %c0_i32 : i32
    %1 = arith.extui %0 : i1 to i32
    %c0_i32_0 = arith.constant 0 : i32
    %2 = arith.cmpi ne, %1, %c0_i32_0 : i32
    scf.if %2 {
      %cst = arith.constant 0.000000e+00 : f32
      %20 = vector.broadcast %cst : f32 to vector<4x1xf32>
      %c0_11 = arith.constant 0 : index
      %c0_12 = arith.constant 0 : index
      %21 = vector.load %arg5[%c0_11, %c0_12] : memref<4x1xf32, #tpu.memory_space<vmem>>, vector<4x1xf32>
      tpu.vector_store %arg5[%c0_11, %c0_12], %20 {strides = array<i32>} : memref<4x1xf32, #tpu.memory_space<vmem>>, vector<4x1xf32>,
    } else {
    }
    %c0 = arith.constant 0 : index
    %c0_1 = arith.constant 0 : index
    %3 = vector.load %arg2[%c0, %c0_1] : memref<4x32xf32, #tpu.memory_space<vmem>>, vector<4x32xf32>
    %c0_i32_2 = arith.constant 0 : i32
    %4 = arith.cmpi eq, %arg0, %c0_i32_2 : i32
    %5 = arith.extui %4 : i1 to i32
    %c0_i32_3 = arith.constant 0 : i32
    %6 = arith.cmpi ne, %5, %c0_i32_3 : i32
    scf.if %6 {
      %c0_11 = arith.constant 0 : index
      %c0_12 = arith.constant 0 : index
      %20 = vector.load %arg5[%c0_11, %c0_12] : memref<4x1xf32, #tpu.memory_space<vmem>>, vector<4x1xf32>
      %cst = arith.constant dense<0.000000e+00> : vector<4xf32>
      %21 = vector.multi_reduction <add>, %3, %cst [1] : vector<4x32xf32> to vector<4xf32>
      %22 = vector.shape_cast %21 : vector<4xf32> to vector<4x1xf32>
      %23 = arith.addf %20, %22 : vector<4x1xf32>
      %c0_13 = arith.constant 0 : index
      %c0_14 = arith.constant 0 : index
      %24 = vector.load %arg5[%c0_13, %c0_14] : memref<4x1xf32, #tpu.memory_space<vmem>>, vector<4x1xf32>
      tpu.vector_store %arg5[%c0_13, %c0_14], %23 {strides = array<i32>} : memref<4x1xf32, #tpu.memory_space<vmem>>, vector<4x1xf32>,
    } else {
    }
    %c0_i32_4 = arith.constant 0 : i32
    %7 = arith.cmpi eq, %arg0, %c0_i32_4 : i32
    %c0_i32_5 = arith.constant 0 : i32
    %8 = arith.cmpi eq, %arg1, %c0_i32_5 : i32
    %9 = arith.andi %7, %8 : i1
    %10 = arith.extui %9 : i1 to i32
    %c0_i32_6 = arith.constant 0 : i32
    %11 = arith.cmpi ne, %10, %c0_i32_6 : i32
    scf.if %11 {
      %c0_11 = arith.constant 0 : index
      %c0_12 = arith.constant 0 : index
      %20 = vector.load %arg5[%c0_11, %c0_12] : memref<4x1xf32, #tpu.memory_space<vmem>>, vector<4x1xf32>
      %cst = arith.constant 3.125000e-02 : f32
      %21 = vector.broadcast %cst : f32 to vector<4x1xf32>
      %22 = arith.mulf %20, %21 : vector<4x1xf32>
      %c0_13 = arith.constant 0 : index
      %c0_14 = arith.constant 0 : index
      %23 = vector.load %arg3[%c0_13, %c0_14] : memref<4x1xf32, #tpu.memory_space<vmem>>, vector<4x1xf32>
      tpu.vector_store %arg3[%c0_13, %c0_14], %22 {strides = array<i32>} : memref<4x1xf32, #tpu.memory_space<vmem>>, vector<4x1xf32>,
    } else {
    }
    %c1_i32 = arith.constant 1 : i32
    %12 = arith.cmpi eq, %arg0, %c1_i32 : i32
    %13 = arith.extui %12 : i1 to i32
    %c0_i32_7 = arith.constant 0 : i32
    %14 = arith.cmpi ne, %13, %c0_i32_7 : i32
    scf.if %14 {
      %c0_11 = arith.constant 0 : index
      %c0_12 = arith.constant 0 : index
      %20 = vector.load %arg3[%c0_11, %c0_12] : memref<4x1xf32, #tpu.memory_space<vmem>>, vector<4x1xf32>
      %21 = vector.broadcast %20 : vector<4x1xf32> to vector<4x32xf32>
      %22 = arith.subf %3, %21 : vector<4x32xf32>
      %c0_13 = arith.constant 0 : index
      %c0_14 = arith.constant 0 : index
      %23 = vector.load %arg5[%c0_13, %c0_14] : memref<4x1xf32, #tpu.memory_space<vmem>>, vector<4x1xf32>
      %24 = arith.mulf %22, %22 : vector<4x32xf32>
      %cst = arith.constant dense<0.000000e+00> : vector<4xf32>
      %25 = vector.multi_reduction <add>, %24, %cst [1] : vector<4x32xf32> to vector<4xf32>
      %26 = vector.shape_cast %25 : vector<4xf32> to vector<4x1xf32>
      %27 = arith.addf %23, %26 : vector<4x1xf32>
      %c0_15 = arith.constant 0 : index
      %c0_16 = arith.constant 0 : index
      %28 = vector.load %arg5[%c0_15, %c0_16] : memref<4x1xf32, #tpu.memory_space<vmem>>, vector<4x1xf32>
      tpu.vector_store %arg5[%c0_15, %c0_16], %27 {strides = array<i32>} : memref<4x1xf32, #tpu.memory_space<vmem>>, vector<4x1xf32>,
    } else {
    }
    %c1_i32_8 = arith.constant 1 : i32
    %15 = arith.cmpi eq, %arg0, %c1_i32_8 : i32
    %c0_i32_9 = arith.constant 0 : i32
    %16 = arith.cmpi eq, %arg1, %c0_i32_9 : i32
    %17 = arith.andi %15, %16 : i1
    %18 = arith.extui %17 : i1 to i32
    %c0_i32_10 = arith.constant 0 : i32
    %19 = arith.cmpi ne, %18, %c0_i32_10 : i32
    scf.if %19 {
      %c0_11 = arith.constant 0 : index
      %c0_12 = arith.constant 0 : index
      %20 = vector.load %arg5[%c0_11, %c0_12] : memref<4x1xf32, #tpu.memory_space<vmem>>, vector<4x1xf32>
      %cst = arith.constant 3.125000e-02 : f32
      %21 = vector.broadcast %cst : f32 to vector<4x1xf32>
      %22 = arith.mulf %20, %21 : vector<4x1xf32>
      %cst_13 = arith.constant 9.99999974E-6 : f32
      %23 = vector.broadcast %cst_13 : f32 to vector<4x1xf32>
      %24 = arith.addf %22, %23 : vector<4x1xf32>
      %25 = math.rsqrt %24 : vector<4x1xf32>
      %c0_14 = arith.constant 0 : index
      %c0_15 = arith.constant 0 : index
      %26 = vector.load %arg4[%c0_14, %c0_15] : memref<4x1xf32, #tpu.memory_space<vmem>>, vector<4x1xf32>
      tpu.vector_store %arg4[%c0_14, %c0_15], %25 {strides = array<i32>} : memref<4x1xf32, #tpu.memory_space<vmem>>, vector<4x1xf32>,
    } else {
    }
    return
  }
  func.func @transform_0(%arg0: i32, %arg1: i32) -> (i32, i32) {
    %c0_i32 = arith.constant 0 : i32
    %c0_i32_0 = arith.constant 0 : i32
    return %c0_i32, %arg1 : i32, i32
  }
  func.func @transform_1(%arg0: i32, %arg1: i32) -> (i32, i32) {
    %c0_i32 = arith.constant 0 : i32
    %c0_i32_0 = arith.constant 0 : i32
    %c0_i32_1 = arith.constant 0 : i32
    return %c0_i32, %c0_i32_0 : i32, i32
  }
  func.func @transform_2(%arg0: i32, %arg1: i32) -> (i32, i32) {
    %c0_i32 = arith.constant 0 : i32
    %c0_i32_0 = arith.constant 0 : i32
    %c0_i32_1 = arith.constant 0 : i32
    return %c0_i32, %c0_i32_0 : i32, i32
  }
}

</mosaic_0001>

<bundles_post_ra>
// kernel: tpu_custom_call.1
= control target key start
LH: loop header
LB: loop body
LE: loop exit
PB: predicated region body
PF: predicated region fallthrough
CT: control target
= control target key end

     0   :  { %8 = vsyncpa [#allocation4], 0  ;;  %s368_s9 = smov 0   ;;  %s370_s10 = smov 0   ;;  %s458_s0 = inlined_call_operand.hbm [shape: f32[4,32], index: 0, kind: input, shape index: {}]   ;;  %s459_s1 = inlined_call_operand.vmem [shape: f32[4,1], index: 1, kind: output, shape index: {0}]   ;;  %s460_s2 = inlined_call_operand.vmem [shape: f32[4,1], index: 2, kind: output, shape index: {1}]  }
   0x1   :  { %s372_s11 = smov 0  }
   0x2 LB: > { %s241_s12 = sadd.s32 4294967295, %s348_s11   ;;  %s26_s13 = sadd.s32 1, %s344_s10  ;;  %s348_s11 = sphi %s372_s11, %s14_s11   ;;  %s344_s10 = sphi %s370_s10, %s470_s10   ;;  %s340_s9 = sphi %s368_s9, %s469_s9  }
   0x3   : > { %p28_p0 = scmp.ge.s32.totalorder %s26_s13, 2  ;;  %p242_p1 = scmp.ge.s32.totalorder %s348_s11, 1 }
   0x4   : > { %p99_p2 = scmp.lt.s32.totalorder %s348_s11, 3  ;;  %p393_p4 = scmp.eq.s32.totalorder %s241_s12, 0 }
   0x5   : > { %s472_s13 = smov (%p28_p0, %s26_s13), 0  ;;  %s350_s16 = smov [#allocation3]  }
   0x6   : > { %p389_p3 = pnand %p242_p1, %p99_p2  ;;  %s114_s17 = sshll.u32 %s350_s16, 4  ;;  %s115_s17 = int_to_ptr.vmem [resolvable:$true] %s114_s17 }
   0x7   : > { %s465_s15 = scalar_select %p393_p4, 1, 0 }
   0x8   : > { %s464_s14 = scalar_select %p389_p3, 1, 0 }
   0x9   : > { %p258_p5 = pneg %p389_p3  ;;  %s294_s21 = scalar_lea.hbm %s458_s0, 64 }
   0xa   : > { %p295_p7 = scmp.ne.s32.totalorder %s458_s0, %s294_s21  ;;  %p301_p11 = scmp.lt.u32.totalorder %s294_s21, %s458_s0 }
   0xb   : > { %p401_p6 = pnand %p393_p4, %p258_p5 }
   0xd   : > { %p296_p8 = pneg %p401_p6 }
   0xf   : > { %p297_p9 = pnand %p296_p8, %p295_p7 }
  0x11   : > { %p298_p10 = pneg %p297_p9 }
  0x13   : > { %p303_p12 = pnand %p301_p11, %p298_p10 }
  0x15   : > { %306 = shalt.err (!%p303_p12)
}
  0x16   : > { %s307_s26 = scalar_lea.vmem %s115_s17, 64  ;;  %p315_p2 = scmp.lt.s32.totalorder %s115_s17, %s115_s17 }
  0x17   : > { %p308_p13 = scmp.ne.s32.totalorder %s115_s17, %s307_s26  ;;  %p316_p5 = scmp.lt.s32.totalorder %s307_s26, %s307_s26 }
  0x19   : > { %p310_p0 = pnand %p308_p13, %p296_p8  ;;  %p317_p4 = por %p316_p5, %p315_p2 }
  0x1b   : > { %p311_p1 = pneg %p310_p0 }
  0x1d   : > { %p318_p3 = pnand %p317_p4, %p311_p1 }
  0x1f   : > { %321 = shalt.err (!%p318_p3)
}
  0x20   : > { %261 = dma.hbm_to_vmem [thread:$0]  (!%p401_p6), %s458_s0, 64, %s115_s17, [#allocation4]  }
  0x21   : > { %p467_p7 = scmp.ne.s32.totalorder %s464_s14, 0 }
  0x22   : > { %p468_p9 = scmp.ne.s32.totalorder (!%p467_p7), %s465_s15, 0 }
  0x23   : > { %127 = sbr.rel (%p467_p7) target bundleno = 509 (0x1fd), region = 24 }
  0x2a   : > { %335 = dma.done.wait (%p468_p9), [#allocation4], 64  }
  0x2b   : > { %337 = vsyncadd (%p468_p9), [#allocation4], 4294967232  ;;  %vm143_vm0 = vcmask 3072   ;;  %p146_p8 = scmp.eq.s32.totalorder %s340_s9, 0  ;;  %v351_v0 = vmov 0.0   ;;  %p246_p3 = scmp.ne.s32.totalorder %s340_s9, 0 }
  0x2c   : > { %144 = vst.msk [vmem:[#allocation2] sm:$0xf] %vm143_vm0, %v351_v0  ;;  %v145_v1 = vld [vmem:[#allocation3] sm:$0xf]  ;;  %vm151_vm1 = vcmask (!%p246_p3), 257024  }
  0x2d   : > { %149 = sbr.rel (%p246_p3) target bundleno = 191 (0xbf), region = 36  ;;  %v152_v2 = vsel (!%p246_p3), %vm151_vm1, %v145_v1, 0.0 }
  0x2e   : > { %153 = vadd.xlane.f32.xlu0 (!%p246_p3), %v152_v2 }
  0x33   : > { %v150_v3 = vld [vmem:[#allocation2] sm:$0xf] (!%p246_p3) }
  0xbb   : > { %v154_v4 = vpop.xlane.xlu0 %153 }
  0xbc   : > { %v155_v5 = vadd.f32 %v154_v4, %v150_v3 }
  0xbe   : > { %157 = vst.msk [vmem:[#allocation2] sm:$0xf] %vm143_vm0, %v155_v5 }
  0xbf PF: > { %161 = sbr.rel (!%p146_p8) target bundleno = 201 (0xc9), region = 40 }
  0xc5   : > { %v162_v6 = vld [vmem:[#allocation2] sm:$0xf] (%p146_p8) }
  0xc6   : > { %v163_v7 = vmul.f32 0.03125, %v162_v6 }
  0xc8   : > { %165 = vst.msk [vmem:[%s459_s1] sm:$0xf] %vm143_vm0, %v163_v7 }
  0xc9 PF: > { %p166_p4 = scmp.eq.s32.totalorder %s340_s9, 1  ;;  %p248_p6 = scmp.ne.s32.totalorder %s340_s9, 1 }
  0xca   : > { %v352_v9 = vmov (!%p248_p6), 0   ;;  %vm179_vm2 = vcmask (!%p248_p6), 257024   ;;  %v177_v14 = vld [vmem:[#allocation2] sm:$0xf] (!%p248_p6) }
  0xcb   : > { %169 = sbr.rel (%p248_p6) target bundleno = 486 (0x1e6), region = 44  ;;  %291 = vset.pattern.permute.xlu0 (!%p248_p6), %v352_v9 }
  0xcf   : > { %v170_v8 = vld [vmem:[%s459_s1] sm:$0xf] (!%p248_p6) }
  0xd0   : > { %173 = vperm.xlu0 (!%p248_p6), %291, %v170_v8  }
 0x14f   : > { %v174_v10 = vpop.permute.xlu0 %173 }
 0x150   : > { %v176_v11 = vsub.f32 %v145_v1, %v174_v10 }
 0x152   : > { %v178_v12 = vmul.f32 %v176_v11, %v176_v11 }
 0x154   : > { %v180_v13 = vsel %vm179_vm2, %v178_v12, 0.0 }
 0x155   : > { %181 = vadd.xlane.f32.xlu0 %v180_v13 }
 0x1e2   : > { %v182_v15 = vpop.xlane.xlu0 %181 }
 0x1e3   : > { %v183_v16 = vadd.f32 %v182_v15, %v177_v14 }
 0x1e5   : > { %185 = vst.msk [vmem:[#allocation2] sm:$0xf] %vm143_vm0, %v183_v16 }
 0x1e6 PF: > { %189 = sbr.rel (!%p166_p4) target bundleno = 509 (0x1fd), region = 48 }
 0x1ec   : > { %v190_v17 = vld [vmem:[#allocation2] sm:$0xf] (%p166_p4) }
 0x1ed   : > { %v191_v18 = vmul.f32 0.03125, %v190_v17 }
 0x1ef   : > { %v192_v19 = vadd.f32 1e-05, %v191_v18 }
 0x1f1   : > { %292 = vrsqrt.f32 %v192_v19 }
 0x1fb   : > { %v293_v20 = vpop.eup %292 }
 0x1fc   : > { %195 = vst.msk [vmem:[%s460_s2] sm:$0xf] %vm143_vm0, %v293_v20 }
 0x1fd PF: > { %s14_s11 = sadd.s32 1, %s348_s11   ;;  %s469_s9 = smov %s344_s10 }
 0x1fe   : > { %p11_p10 = scmp.ge.s32.totalorder %s14_s11, 4   ;;  %s470_s10 = smov %s472_s13 }
 0x200   :  { %13 = sbr.rel (!%p11_p10) target bundleno = 2 (0x2), region = 81 }
 0x207   :  { %213 = vsyncpa [#allocation4], 1 }
 0x208   :  { %215 = vsyncpa [#allocation4 + $0x1], 1 }

</bundles_post_ra>
